<compile_context>
chip_gen: v7x
topology: tpu7x:2x2x1
jax: 0.10.0
libtpu: 0.0.40
codegen_flags: <defaults>
</compile_context>

<pallas_src>
import functools

import jax
import jax.numpy as jnp
from jax.experimental import pallas as pl
from jax.experimental.pallas import tpu as pltpu

_VMEM_LIMIT_BYTES = 48 * 1024 * 1024   # > default scoped 32 MiB, < v7x physical 64 MiB
_VMEM_TILE_BUDGET = 24 * 1024 * 1024   # double-buffered working set target


# ----------------------------------------------------------------------------
# Triplet-distance kernel (feature-major layout: inputs are (D, batch_tile))
# ----------------------------------------------------------------------------
def _triplet_kernel(a_ref, p_ref, n_ref, loss_ref, *, margin):
    a = a_ref[...].astype(jnp.float32)          # (D, bt)
    p = p_ref[...].astype(jnp.float32)
    n = n_ref[...].astype(jnp.float32)

    dp = a - p
    dn = a - n
    # Fused: single cross-sublane reduction over the feature axis.
    d = dp * dp - dn * dn                       # (D, bt)
    per_sample = jnp.sum(d, axis=0, keepdims=True)   # (1, bt)  lane-dense
    loss_ref[...] = jnp.maximum(per_sample + margin, 0.0)


def _pick_batch_tile(B, D, in_itemsize):
    # bytes per batch column: 3 double-buffered inputs + one f32 output row
    per_col = 2 * (3 * D * in_itemsize + 4)
    if per_col * B <= _VMEM_TILE_BUDGET:
        return B                                 # whole batch in one block
    bt = (_VMEM_TILE_BUDGET // per_col) // 128 * 128
    return max(128, min(bt, 4096))


def triplet_losses_pallas(anchor, positive, negative, *, margin):
    """Per-sample relu(||a-p||^2 - ||a-n||^2 + margin), shape (B,) f32."""
    B, D = anchor.shape
    assert positive.shape == (B, D) and negative.shape == (B, D)
    itemsize = jnp.dtype(anchor.dtype).itemsize

    # Feature-major layout: batch on the 128-lane axis (lane-dense for small D).
    a_t, p_t, n_t = anchor.T, positive.T, negative.T

    bt = _pick_batch_tile(B, D, itemsize)
    b_pad = -(-B // bt) * bt
    if b_pad != B:
        pad = ((0, 0), (0, b_pad - B))
        a_t = jnp.pad(a_t, pad)
        p_t = jnp.pad(p_t, pad)
        n_t = jnp.pad(n_t, pad)

    emb_spec = pl.BlockSpec((D, bt), lambda i: (0, i))
    cost = pl.CostEstimate(
        flops=8 * b_pad * D,
        transcendentals=0,
        bytes_accessed=3 * b_pad * D * itemsize + b_pad * 4,
    )

    out = pl.pallas_call(
        functools.partial(_triplet_kernel, margin=float(margin)),
        out_shape=jax.ShapeDtypeStruct((1, b_pad), jnp.float32),
        grid_spec=pltpu.PrefetchScalarGridSpec(
            num_scalar_prefetch=0,
            grid=(b_pad // bt,),
            in_specs=[emb_spec, emb_spec, emb_spec],
            out_specs=pl.BlockSpec((1, bt), lambda i: (0, i)),
        ),
        compiler_params=pltpu.CompilerParams(
            dimension_semantics=("parallel",),        # independent tiles
            vmem_limit_bytes=_VMEM_LIMIT_BYTES,
        ),
        cost_estimate=cost,
    )(a_t, p_t, n_t)
    return out[0, :B]


# ----------------------------------------------------------------------------
# Cross-entropy (softmax) kernel: per-row NLL of logits (N, C) vs targets (N,)
# ----------------------------------------------------------------------------
def _xent_kernel(logits_ref, tgt_ref, nll_ref):
    logits = logits_ref[...].astype(jnp.float32)      # (rt, C)
    tgt = tgt_ref[...]                                # (rt, 1) int32
    rt, C = logits.shape

    col = jax.lax.broadcasted_iota(jnp.int32, (rt, C), 1)
    onehot = col == tgt                               # (rt, C)

    m = jnp.max(logits, axis=1, keepdims=True)
    lse = m + jnp.log(jnp.sum(jnp.exp(logits - m), axis=1, keepdims=True))
    tgt_logit = jnp.sum(jnp.where(onehot, logits, 0.0), axis=1, keepdims=True)
    nll_ref[...] = lse - tgt_logit                    # (rt, 1)


def cross_entropy_pallas(logits, targets):
    """Per-row cross entropy (no reduction), shape (N,) f32; targets 0-indexed."""
    N, C = logits.shape
    itemsize = jnp.dtype(logits.dtype).itemsize
    rt = N if N <= 1024 else 512
    n_pad = -(-N // rt) * rt
    tgt = targets.astype(jnp.int32)
    if n_pad != N:
        logits = jnp.pad(logits, ((0, n_pad - N), (0, 0)))
        tgt = jnp.pad(tgt, ((0, n_pad - N),))
    tgt2d = tgt.reshape(n_pad, 1)

    out = pl.pallas_call(
        _xent_kernel,
        out_shape=jax.ShapeDtypeStruct((n_pad, 1), jnp.float32),
        grid_spec=pltpu.PrefetchScalarGridSpec(
            num_scalar_prefetch=0,
            grid=(n_pad // rt,),
            in_specs=[pl.BlockSpec((rt, C), lambda i: (i, 0)),
                      pl.BlockSpec((rt, 1), lambda i: (i, 0))],
            out_specs=pl.BlockSpec((rt, 1), lambda i: (i, 0)),
        ),
        compiler_params=pltpu.CompilerParams(
            dimension_semantics=("parallel",),
            vmem_limit_bytes=_VMEM_LIMIT_BYTES,
        ),
        cost_estimate=pl.CostEstimate(
            flops=6 * n_pad * C,
            transcendentals=n_pad * (C + 1),
            bytes_accessed=n_pad * C * itemsize + n_pad * 8,
        ),
    )(logits, tgt2d)
    return out[:N, 0]


# ----------------------------------------------------------------------------
# Full forward pass of OnlineTripletSoftmaxLoss
# ----------------------------------------------------------------------------
def online_triplet_softmax_loss(anchor_embed, pos_embed, neg_embed, preds,
                                labels, labels_neg, *, margin=0.0,
                                lambda_factor=0.0):
    # TODO(synk): triplet_selector.get_triplets (online hard-triplet mining) is a
    # data-dependent host-side selector with no clean Pallas equivalent; this
    # implements the `num_triplets == 0` path (direct anchor/pos/neg triplets).
    triplet_losses = triplet_losses_pallas(
        anchor_embed, pos_embed, neg_embed, margin=margin)
    triplet_mean = jnp.mean(triplet_losses)

    # target = cat(labels, labels, labels_neg) - 1  (labels are 1-indexed)
    target = jnp.concatenate([labels, labels, labels_neg], axis=0).astype(jnp.int32) - 1
    loss_softmax = jnp.mean(cross_entropy_pallas(preds, target))

    loss_total = lambda_factor * triplet_mean + loss_softmax
    return loss_total, triplet_mean, loss_softmax


# ----------------------------------------------------------------------------
# Demo / self-check
# ----------------------------------------------------------------------------
if __name__ == "__main__":
    key = jax.random.PRNGKey(0)
    k1, k2, k3, k4, k5, k6 = jax.random.split(key, 6)

    B, D, C = 16, 32, 10
    anchor = jax.random.normal(k1, (B, D), dtype=jnp.float32)
    positive = jax.random.normal(k2, (B, D), dtype=jnp.float32)
    negative = jax.random.normal(k3, (B, D), dtype=jnp.float32)
    preds = jax.random.normal(k4, (3 * B, C), dtype=jnp.float32)
    labels = jax.random.randint(k5, (B,), 1, C + 1)       # 1-indexed, as in module
    labels_neg = jax.random.randint(k6, (B,), 1, C + 1)

    margin, lam = 1.0, 0.5
    loss_total, trip_mean, ce = online_triplet_softmax_loss(
        anchor, positive, negative, preds, labels, labels_neg,
        margin=margin, lambda_factor=lam)
    loss_total = jax.block_until_ready(loss_total)

    # Pure-JAX reference.
    dp = jnp.sum((anchor - positive) ** 2, axis=1)
    dn = jnp.sum((anchor - negative) ** 2, axis=1)
    trip_ref = jnp.mean(jnp.maximum(dp - dn + margin, 0.0))
    tgt_ref = jnp.concatenate([labels, labels, labels_neg]) - 1
    logp = jax.nn.log_softmax(preds, axis=-1)
    ce_ref = -jnp.mean(jnp.take_along_axis(logp, tgt_ref[:, None], axis=1)[:, 0])
    total_ref = lam * trip_ref + ce_ref

    assert jnp.allclose(trip_mean, trip_ref, rtol=1e-5, atol=1e-5), (trip_mean, trip_ref)
    assert jnp.allclose(ce, ce_ref, rtol=1e-5, atol=1e-5), (ce, ce_ref)
    assert jnp.allclose(loss_total, total_ref, rtol=1e-5, atol=1e-5), (loss_total, total_ref)

    print("KERNEL_OK")
</pallas_src>

<mosaic_0001>
module attributes {stable_mosaic.version = 11 : i64} {
  func.func @_triplet_kernel(%arg0: i32, %arg1: memref<32x16xf32, #tpu.memory_space<vmem>>, %arg2: memref<32x16xf32, #tpu.memory_space<vmem>>, %arg3: memref<32x16xf32, #tpu.memory_space<vmem>>, %arg4: memref<1x16xf32, #tpu.memory_space<vmem>>) attributes {dimension_semantics = [#tpu.dimension_semantics<parallel>], iteration_bounds = array<i64: 1>, scalar_prefetch = 0 : i64, scratch_operands = 0 : i64, tpu.core_type = #tpu.core_type<tc>, window_params = [{transform_indices = @transform_0, window_bounds = array<i64: 32, 16>}, {transform_indices = @transform_1, window_bounds = array<i64: 32, 16>}, {transform_indices = @transform_2, window_bounds = array<i64: 32, 16>}, {transform_indices = @transform_3, window_bounds = array<i64: 1, 16>}]} {
    %c0 = arith.constant 0 : index
    %c0_0 = arith.constant 0 : index
    %0 = vector.load %arg1[%c0, %c0_0] : memref<32x16xf32, #tpu.memory_space<vmem>>, vector<32x16xf32>
    %c0_1 = arith.constant 0 : index
    %c0_2 = arith.constant 0 : index
    %1 = vector.load %arg2[%c0_1, %c0_2] : memref<32x16xf32, #tpu.memory_space<vmem>>, vector<32x16xf32>
    %c0_3 = arith.constant 0 : index
    %c0_4 = arith.constant 0 : index
    %2 = vector.load %arg3[%c0_3, %c0_4] : memref<32x16xf32, #tpu.memory_space<vmem>>, vector<32x16xf32>
    %3 = arith.subf %0, %1 : vector<32x16xf32>
    %4 = arith.subf %0, %2 : vector<32x16xf32>
    %5 = arith.mulf %3, %3 : vector<32x16xf32>
    %6 = arith.mulf %4, %4 : vector<32x16xf32>
    %7 = arith.subf %5, %6 : vector<32x16xf32>
    %cst = arith.constant dense<0.000000e+00> : vector<16xf32>
    %8 = vector.multi_reduction <add>, %7, %cst [0] : vector<32x16xf32> to vector<16xf32>
    %9 = vector.shape_cast %8 : vector<16xf32> to vector<1x16xf32>
    %cst_5 = arith.constant 1.000000e+00 : f32
    %10 = vector.broadcast %cst_5 : f32 to vector<1x16xf32>
    %11 = arith.addf %9, %10 : vector<1x16xf32>
    %cst_6 = arith.constant 0.000000e+00 : f32
    %12 = vector.broadcast %cst_6 : f32 to vector<1x16xf32>
    %13 = arith.maximumf %11, %12 : vector<1x16xf32>
    %c0_7 = arith.constant 0 : index
    %c0_8 = arith.constant 0 : index
    %14 = vector.load %arg4[%c0_7, %c0_8] : memref<1x16xf32, #tpu.memory_space<vmem>>, vector<1x16xf32>
    tpu.vector_store %arg4[%c0_7, %c0_8], %13 {strides = array<i32>} : memref<1x16xf32, #tpu.memory_space<vmem>>, vector<1x16xf32>,
    return
  }
  func.func @transform_0(%arg0: i32) -> (i32, i32) {
    %c0_i32 = arith.constant 0 : i32
    %c0_i32_0 = arith.constant 0 : i32
    return %c0_i32, %arg0 : i32, i32
  }
  func.func @transform_1(%arg0: i32) -> (i32, i32) {
    %c0_i32 = arith.constant 0 : i32
    %c0_i32_0 = arith.constant 0 : i32
    return %c0_i32, %arg0 : i32, i32
  }
  func.func @transform_2(%arg0: i32) -> (i32, i32) {
    %c0_i32 = arith.constant 0 : i32
    %c0_i32_0 = arith.constant 0 : i32
    return %c0_i32, %arg0 : i32, i32
  }
  func.func @transform_3(%arg0: i32) -> (i32, i32) {
    %c0_i32 = arith.constant 0 : i32
    %c0_i32_0 = arith.constant 0 : i32
    return %c0_i32, %arg0 : i32, i32
  }
}

</mosaic_0001>

<bundles_post_ra>
// kernel: tpu_custom_call.1
= control target key start
LH: loop header
LB: loop body
LE: loop exit
PB: predicated region body
PF: predicated region fallthrough
CT: control target
= control target key end

     0   :  { %s173_s0 = inlined_call_operand.vmem [shape: f32[32,16], index: 0, kind: input, shape index: {}]   ;;  %s174_s1 = inlined_call_operand.vmem [shape: f32[32,16], index: 1, kind: input, shape index: {}]   ;;  %s175_s2 = inlined_call_operand.vmem [shape: f32[32,16], index: 2, kind: input, shape index: {}]   ;;  %s176_s3 = inlined_call_operand.hbm [shape: f32[1,16], index: 3, kind: output, shape index: {}]  }
   0x1   :  { %v15_v0 = vld [vmem:[%s173_s0] sm:$0xff]  ;;  %v16_v1 = vld [vmem:[%s173_s0 + $0x8] sm:$0xff]  ;;  %v17_v2 = vld [vmem:[%s173_s0 + $0x10] sm:$0xff] }
   0x2   :  { %v18_v3 = vld [vmem:[%s173_s0 + $0x18] sm:$0xff]  ;;  %v19_v4 = vld [vmem:[%s174_s1] sm:$0xff]  ;;  %v20_v5 = vld [vmem:[%s174_s1 + $0x8] sm:$0xff] }
   0x3   :  { %v21_v6 = vld [vmem:[%s174_s1 + $0x10] sm:$0xff]  ;;  %v22_v7 = vld [vmem:[%s174_s1 + $0x18] sm:$0xff]  ;;  %v23_v8 = vld [vmem:[%s175_s2] sm:$0xff]  ;;  %v27_v9 = vsub.f32 %v15_v0, %v19_v4  ;;  %v28_v10 = vsub.f32 %v16_v1, %v20_v5 }
   0x4   :  { %v24_v11 = vld [vmem:[%s175_s2 + $0x8] sm:$0xff]  ;;  %v25_v12 = vld [vmem:[%s175_s2 + $0x10] sm:$0xff]  ;;  %v26_v13 = vld [vmem:[%s175_s2 + $0x18] sm:$0xff]  ;;  %v29_v14 = vsub.f32 %v17_v2, %v21_v6  ;;  %v30_v15 = vsub.f32 %v18_v3, %v22_v7  ;;  %v31_v16 = vsub.f32 %v15_v0, %v23_v8 }
   0x5   :  { %v32_v17 = vsub.f32 %v16_v1, %v24_v11  ;;  %v33_v18 = vsub.f32 %v17_v2, %v25_v12  ;;  %v34_v19 = vsub.f32 %v18_v3, %v26_v13  ;;  %v35_v20 = vmul.f32 %v27_v9, %v27_v9 }
   0x6   :  { %8 = vsyncpa [#allocation3], 0  ;;  %v36_v21 = vmul.f32 %v28_v10, %v28_v10  ;;  %v37_v22 = vmul.f32 %v29_v14, %v29_v14  ;;  %v38_v23 = vmul.f32 %v30_v15, %v30_v15  ;;  %v39_v24 = vmul.f32 %v31_v16, %v31_v16  ;;  %s104_s1 = smov [#allocation2]  }
   0x7   :  { %v40_v25 = vmul.f32 %v32_v17, %v32_v17  ;;  %v41_v26 = vmul.f32 %v33_v18, %v33_v18  ;;  %v42_v27 = vmul.f32 %v34_v19, %v34_v19  ;;  %vm47_vm0 = vcmask 130048   ;;  %s71_s2 = sshll.u32 %s104_s1, 4  ;;  %s72_s2 = int_to_ptr.vmem [resolvable:$true] %s71_s2 }
   0x8   :  { %v43_v28 = vsub.f32 %v35_v20, %v39_v24  ;;  %vm63_vm1 = vcmask 122880   ;;  %s80_s8 = scalar_lea.vmem %s72_s2, 16  ;;  %s84_s9 = scalar_lea.vmem %s72_s2, 32 }
   0x9   :  { %v44_v29 = vsub.f32 %v36_v21, %v40_v25  ;;  %v45_v30 = vsub.f32 %v37_v22, %v41_v26  ;;  %v46_v31 = vsub.f32 %v38_v23, %v42_v27  ;;  %p81_p0 = scmp.ne.s32.totalorder %s72_s2, %s80_s8  ;;  %p85_p1 = scmp.lt.s32.totalorder %s72_s2, %s72_s2 }
   0xa   :  { %v48_v32 = vsel %vm47_vm0, %v43_v28, 0.0  ;;  %p86_p2 = scmp.lt.s32.totalorder %s84_s9, %s80_s8 }
   0xb   :  { %v49_v33 = vsel %vm47_vm0, %v44_v29, 0.0  ;;  %v51_v34 = vsel %vm47_vm0, %v45_v30, 0.0  ;;  %v53_v36 = vsel %vm47_vm0, %v46_v31, 0.0 }
   0xc   :  { %v50_v35 = vadd.f32 %v49_v33, %v48_v32  ;;  %p87_p3 = por %p86_p2, %p85_p1 }
   0xe   :  { %v52_v37 = vadd.f32 %v51_v34, %v50_v35  ;;  %p88_p4 = pnand %p87_p3, %p81_p0 }
  0x10   :  { %v54_v38 = vadd.f32 %v53_v36, %v52_v37 }
  0x12   :  { %v55_v39 = vrot.slane %v54_v38, 4 }
  0x14   :  { %v56_v40 = vadd.f32 %v55_v39, %v54_v38 }
  0x16   :  { %v57_v41 = vrot.slane %v56_v40, 2 }
  0x18   :  { %v58_v42 = vadd.f32 %v57_v41, %v56_v40 }
  0x1a   :  { %v59_v43 = vrot.slane %v58_v42, 1 }
  0x1c   :  { %v60_v44 = vadd.f32 %v59_v43, %v58_v42 }
  0x1e   :  { %v61_v45 = vadd.f32 1.0, %v60_v44 }
  0x20   :  { %v62_v46 = vmax.f32 %v61_v45, 0.0 }
  0x22   :  { %64 = vst.msk [vmem:[#allocation2] sm:$0x1] %vm63_vm1, %v62_v46 }
  0x23   :  { %91 = shalt.err (!%p88_p4)
}
  0x24   :  { %s92_s12 = scalar_lea.hbm %s176_s3, 16 }
  0x25   :  { %p93_p5 = scmp.ne.s32.totalorder %s176_s3, %s92_s12  ;;  %p96_p6 = scmp.lt.u32.totalorder %s92_s12, %s176_s3 }
  0x27   :  { %p98_p7 = pnand %p96_p6, %p93_p5 }
  0x29   :  { %101 = shalt.err (!%p98_p7)
}
  0x2a   :  { %74 = dma.vmem_to_hbm [thread:$0]  %s72_s2, 16, %s176_s3, [#allocation3]  }
  0x2b   :  { %102 = dma.done.wait [#allocation3], 16  }
  0x2c   :  { %103 = vsyncadd [#allocation3], 4294967280 }
  0x2d   :  { %78 = vsyncpa [#allocation3], 1 }

</bundles_post_ra>
